<compile_context>
chip_gen: v5e
topology: v5e:2x2
jax: 0.10.0
libtpu: 0.0.40
codegen_flags: <defaults>
</compile_context>

<pallas_src>
import functools
import math

import jax
import jax.numpy as jnp
from jax.experimental import pallas as pl
from jax.experimental.pallas import tpu as pltpu

LANE = 128      # vreg lane width
SUBLANE = 8     # vreg sublane height (f32)


def _round_up(n, m):
    return ((n + m - 1) // m) * m


# ----------------------------------------------------------------------------- kernel
def mlp_policy_kernel(x_ref, w0_ref, b0_ref, w1_ref, b1_ref, w2_ref, b2_ref, o_ref):
    # hidden layer 0: relu(x @ W0 + b0)   (MXU f32 accumulation, VPU bias+relu in f32)
    h = jnp.dot(x_ref[...], w0_ref[...], preferred_element_type=jnp.float32)
    h = jnp.maximum(h + b0_ref[...], 0.0)
    # hidden layer 1: relu(h @ W1 + b1)
    h = jnp.dot(h.astype(w1_ref.dtype), w1_ref[...], preferred_element_type=jnp.float32)
    h = jnp.maximum(h + b1_ref[...], 0.0)
    # output layer: tanh(h @ W2 + b2)  (tanh on EUP, f32)
    out = jnp.dot(h.astype(w2_ref.dtype), w2_ref[...],
                  preferred_element_type=jnp.float32) + b2_ref[...]
    o_ref[...] = jnp.tanh(out).astype(o_ref.dtype)


# ------------------------------------------------------------------ one-time param prep
def prepare_padded_params(params, *, matmul_dtype=jnp.float32):
    """Pad & cast the weights/biases once (hoisted out of the per-call wrapper).

    Weights are stored (in_features, out_features) — the transpose of PyTorch's
    (out, in) storage — so the kernel computes x @ W + b == F.linear(x, W.T, b).
    Returns (padded_arrays_pytree, static_meta).
    """
    w0, b0 = params["w0"], params["b0"]
    w1, b1 = params["w1"], params["b1"]
    w2, b2 = params["w2"], params["b2"]
    S, H0 = w0.shape
    H1 = w1.shape[1]
    A = w2.shape[1]

    sub = 16 if jnp.dtype(matmul_dtype).itemsize < 4 else SUBLANE
    # Contraction dim S: sublane alignment only. Matmul-output lane dims: full 128.
    S_p = _round_up(S, sub)
    H0_p, H1_p, A_p = (_round_up(d, LANE) for d in (H0, H1, A))

    def pad2(a, rows, cols, dtype):
        a = a.astype(jnp.float32)
        a = jnp.pad(a, ((0, rows - a.shape[0]), (0, cols - a.shape[1])))
        return a.astype(dtype)

    padded = {
        "w0": pad2(w0, S_p, H0_p, matmul_dtype),
        "b0": pad2(b0, 1, H0_p, jnp.float32),
        "w1": pad2(w1, H0_p, H1_p, matmul_dtype),
        "b1": pad2(b1, 1, H1_p, jnp.float32),
        "w2": pad2(w2, H1_p, A_p, matmul_dtype),
        "b2": pad2(b2, 1, A_p, jnp.float32),
    }
    meta = {
        "dims": (S, H0, H1, A),
        "padded_dims": (S_p, H0_p, H1_p, A_p),
        "matmul_dtype": jnp.dtype(matmul_dtype),
    }
    return padded, meta


def _vmem_bytes_estimate(tile_b, S_p, H0_p, H1_p, A_p, mat_itemsize):
    def tb(r, c, itemsize):  # internal VMEM layout pads to (8, 128) tiles
        return _round_up(r, SUBLANE) * _round_up(c, LANE) * itemsize
    x_bytes = 2 * tb(tile_b, S_p, mat_itemsize)          # double-buffered input tile
    o_bytes = 2 * tb(tile_b, A_p, 4)                     # double-buffered output tile
    w_bytes = (tb(S_p, H0_p, mat_itemsize) + tb(H0_p, H1_p, mat_itemsize)
               + tb(H1_p, A_p, mat_itemsize))            # Buffered(1) residents
    b_bytes = tb(1, H0_p, 4) + tb(1, H1_p, 4) + tb(1, A_p, 4)
    return x_bytes + o_bytes + w_bytes + b_bytes


# ---------------------------------------------------------------------------- wrapper
def mlp_deterministic_policy(x, padded, *, meta, max_tile_b=1024, trim_output=True):
    """Forward pass of MLPDeterministicPolicy in one Pallas kernel.

    x: (B, state_dim) float array; padded/meta from prepare_padded_params().
    Returns (B, action_dim) float32 tanh-squashed actions (or the lane-padded
    (B_p, 128) block if trim_output=False, to save the post-slice copy).
    """
    S, H0, H1, A = meta["dims"]
    S_p, H0_p, H1_p, A_p = meta["padded_dims"]
    mdtype = meta["matmul_dtype"]
    B = x.shape[0]
    assert x.shape[1] == S, f"expected state_dim={S}, got {x.shape[1]}"

    align = 16 if mdtype.itemsize < 4 else SUBLANE
    # Balanced batch tiling: minimize zero-row padding; keep >=2 grid steps when the
    # batch allows so the "parallel" batch axis shards across both TCs on v7x.
    n_steps = max(pl.cdiv(B, max_tile_b), min(2, pl.cdiv(B, align)))
    tile_b = _round_up(pl.cdiv(B, n_steps), align)
    B_p = n_steps * tile_b

    x_p = x.astype(jnp.float32)
    if (B_p, S_p) != (B, S):
        x_p = jnp.pad(x_p, ((0, B_p - B), (0, S_p - S)))
    x_p = x_p.astype(mdtype)

    # Weight / bias blocks: constant index_map -> stay resident in VMEM across grid
    # steps; Buffered(1) -> single buffer (no dead double-buffer for constant blocks).
    def resident(shape):
        return pl.BlockSpec(shape, lambda i: (0, 0), pipeline_mode=pl.Buffered(1))

    cp_kwargs = dict(dimension_semantics=("parallel",))
    est = _vmem_bytes_estimate(tile_b, S_p, H0_p, H1_p, A_p, mdtype.itemsize)
    if est > 12 * 1024 * 1024:   # above v5e's 16 MiB default scoped VMEM (w/ headroom)
        cp_kwargs["vmem_limit_bytes"] = int(min(est * 3 // 2, 64 * 1024 * 1024))

    out_p = pl.pallas_call(
        mlp_policy_kernel,
        out_shape=jax.ShapeDtypeStruct((B_p, A_p), jnp.float32),
        grid=(n_steps,),
        in_specs=[
            pl.BlockSpec((tile_b, S_p), lambda i: (i, 0)),   # x: tiled over batch
            resident((S_p, H0_p)),
            resident((1, H0_p)),
            resident((H0_p, H1_p)),
            resident((1, H1_p)),
            resident((H1_p, A_p)),
            resident((1, A_p)),
        ],
        out_specs=pl.BlockSpec((tile_b, A_p), lambda i: (i, 0)),
        compiler_params=pltpu.CompilerParams(**cp_kwargs),
    )(x_p, padded["w0"], padded["b0"], padded["w1"], padded["b1"],
      padded["w2"], padded["b2"])

    if trim_output and (B_p != B or A_p != A):
        out_p = out_p[:B, :A]
    return out_p


# ----------------------------------------------------------------- init & reference
def xavier_uniform(key, fan_in, fan_out, gain=1.0):
    # Matches torch.nn.init.xavier_uniform_ with gain=1; stored as (in, out).
    bound = gain * math.sqrt(6.0 / (fan_in + fan_out))
    return jax.random.uniform(
        key, (fan_in, fan_out), dtype=jnp.float32, minval=-bound, maxval=bound
    )


def init_params(key, state_dim, action_dim, hidden_sizes=(64, 64)):
    k0, k1, k2 = jax.random.split(key, 3)
    h0, h1 = hidden_sizes
    return {
        "w0": xavier_uniform(k0, state_dim, h0),
        "b0": jnp.zeros((1, h0), jnp.float32),
        "w1": xavier_uniform(k1, h0, h1),
        "b1": jnp.zeros((1, h1), jnp.float32),
        "w2": xavier_uniform(k2, h1, action_dim),
        "b2": jnp.zeros((1, action_dim), jnp.float32),
    }


def reference_forward(x, p):
    h = jnp.maximum(x @ p["w0"] + p["b0"], 0.0)
    h = jnp.maximum(h @ p["w1"] + p["b1"], 0.0)
    return jnp.tanh(h @ p["w2"] + p["b2"])


# ------------------------------------------------------------------------------ main
if __name__ == "__main__":
    key = jax.random.PRNGKey(0)
    k_param, k_state, k_state2 = jax.random.split(key, 3)

    batch, state_dim, action_dim = 8, 16, 8
    hidden_sizes = (64, 64)
    params = init_params(k_param, state_dim, action_dim, hidden_sizes)

    # Pad/cast the parameters once (hoisted out of the per-call path).
    padded_f32, meta_f32 = prepare_padded_params(params)
    padded_bf16, meta_bf16 = prepare_padded_params(params, matmul_dtype=jnp.bfloat16)

    # jit-compatible: static metadata baked in; x-pad + kernel + slice fuse into one
    # XLA program per batch shape.
    fwd_f32 = jax.jit(functools.partial(mlp_deterministic_policy, meta=meta_f32))
    fwd_bf16 = jax.jit(functools.partial(mlp_deterministic_policy, meta=meta_bf16))

    # --- f32 matmul path, small batch (single grid step) ---
    state = jax.random.normal(k_state, (batch, state_dim), dtype=jnp.float32)
    out = jax.block_until_ready(fwd_f32(state, padded_f32))
    ref = reference_forward(state, params)
    assert out.shape == (batch, action_dim)
    assert jnp.allclose(out, ref, atol=1e-5, rtol=1e-5), "f32 mismatch vs reference"

    # --- f32 path, non-multiple batch (exercises balanced 2-step grid + padding) ---
    state2 = jax.random.normal(k_state2, (37, state_dim), dtype=jnp.float32)
    out2 = jax.block_until_ready(fwd_f32(state2, padded_f32))
    ref2 = reference_forward(state2, params)
    assert out2.shape == (37, action_dim)
    assert jnp.allclose(out2, ref2, atol=1e-5, rtol=1e-5), "f32 (padded batch) mismatch"

    # --- bf16 matmul path (bf16-native MXU on v5e/v6e/v7x), looser tolerance ---
    out3 = jax.block_until_ready(fwd_bf16(state2, padded_bf16))
    assert out3.shape == (37, action_dim)
    assert jnp.allclose(out3, ref2, atol=5e-2, rtol=5e-2), "bf16 mismatch vs reference"

    print("KERNEL_OK")
</pallas_src>

<mosaic_0001>
module attributes {stable_mosaic.version = 11 : i64} {
  func.func @mlp_policy_kernel(%arg0: i32, %arg1: memref<8x16xf32, #tpu.memory_space<vmem>>, %arg2: memref<16x128xf32, #tpu.memory_space<vmem>>, %arg3: memref<1x128xf32, #tpu.memory_space<vmem>>, %arg4: memref<128x128xf32, #tpu.memory_space<vmem>>, %arg5: memref<1x128xf32, #tpu.memory_space<vmem>>, %arg6: memref<128x128xf32, #tpu.memory_space<vmem>>, %arg7: memref<1x128xf32, #tpu.memory_space<vmem>>, %arg8: memref<8x128xf32, #tpu.memory_space<vmem>>) attributes {dimension_semantics = [#tpu.dimension_semantics<parallel>], iteration_bounds = array<i64: 1>, scalar_prefetch = 0 : i64, scratch_operands = 0 : i64, tpu.core_type = #tpu.core_type<tc>, window_params = [{transform_indices = @transform_0, window_bounds = array<i64: 8, 16>}, {pipeline_mode = #tpu.pipeline_mode<synchronous>, transform_indices = @transform_1, window_bounds = array<i64: 16, 128>}, {pipeline_mode = #tpu.pipeline_mode<synchronous>, transform_indices = @transform_2, window_bounds = array<i64: 1, 128>}, {pipeline_mode = #tpu.pipeline_mode<synchronous>, transform_indices = @transform_3, window_bounds = array<i64: 128, 128>}, {pipeline_mode = #tpu.pipeline_mode<synchronous>, transform_indices = @transform_4, window_bounds = array<i64: 1, 128>}, {pipeline_mode = #tpu.pipeline_mode<synchronous>, transform_indices = @transform_5, window_bounds = array<i64: 128, 128>}, {pipeline_mode = #tpu.pipeline_mode<synchronous>, transform_indices = @transform_6, window_bounds = array<i64: 1, 128>}, {transform_indices = @transform_7, window_bounds = array<i64: 8, 128>}]} {
    %c0 = arith.constant 0 : index
    %c0_0 = arith.constant 0 : index
    %0 = vector.load %arg1[%c0, %c0_0] : memref<8x16xf32, #tpu.memory_space<vmem>>, vector<8x16xf32>
    %c0_1 = arith.constant 0 : index
    %c0_2 = arith.constant 0 : index
    %1 = vector.load %arg2[%c0_1, %c0_2] : memref<16x128xf32, #tpu.memory_space<vmem>>, vector<16x128xf32>
    %cst = arith.constant dense<0.000000e+00> : vector<8x128xf32>
    %2 = tpu.matmul %0, %1, %cst {dimension_numbers = #tpu.dot_dimension_numbers<[1], [0], [0], [1], [0, 0, 1, 1], [], []>} : vector<8x16xf32>, vector<16x128xf32>, vector<8x128xf32> -> vector<8x128xf32>
    %c0_3 = arith.constant 0 : index
    %c0_4 = arith.constant 0 : index
    %3 = vector.load %arg3[%c0_3, %c0_4] : memref<1x128xf32, #tpu.memory_space<vmem>>, vector<1x128xf32>
    %4 = vector.broadcast %3 : vector<1x128xf32> to vector<8x128xf32>
    %5 = arith.addf %2, %4 : vector<8x128xf32>
    %cst_5 = arith.constant 0.000000e+00 : f32
    %6 = vector.broadcast %cst_5 : f32 to vector<8x128xf32>
    %7 = arith.maximumf %5, %6 : vector<8x128xf32>
    %c0_6 = arith.constant 0 : index
    %c0_7 = arith.constant 0 : index
    %8 = vector.load %arg4[%c0_6, %c0_7] : memref<128x128xf32, #tpu.memory_space<vmem>>, vector<128x128xf32>
    %cst_8 = arith.constant dense<0.000000e+00> : vector<8x128xf32>
    %9 = tpu.matmul %7, %8, %cst_8 {dimension_numbers = #tpu.dot_dimension_numbers<[1], [0], [0], [1], [0, 0, 1, 1], [], []>} : vector<8x128xf32>, vector<128x128xf32>, vector<8x128xf32> -> vector<8x128xf32>
    %c0_9 = arith.constant 0 : index
    %c0_10 = arith.constant 0 : index
    %10 = vector.load %arg5[%c0_9, %c0_10] : memref<1x128xf32, #tpu.memory_space<vmem>>, vector<1x128xf32>
    %11 = vector.broadcast %10 : vector<1x128xf32> to vector<8x128xf32>
    %12 = arith.addf %9, %11 : vector<8x128xf32>
    %cst_11 = arith.constant 0.000000e+00 : f32
    %13 = vector.broadcast %cst_11 : f32 to vector<8x128xf32>
    %14 = arith.maximumf %12, %13 : vector<8x128xf32>
    %c0_12 = arith.constant 0 : index
    %c0_13 = arith.constant 0 : index
    %15 = vector.load %arg6[%c0_12, %c0_13] : memref<128x128xf32, #tpu.memory_space<vmem>>, vector<128x128xf32>
    %cst_14 = arith.constant dense<0.000000e+00> : vector<8x128xf32>
    %16 = tpu.matmul %14, %15, %cst_14 {dimension_numbers = #tpu.dot_dimension_numbers<[1], [0], [0], [1], [0, 0, 1, 1], [], []>} : vector<8x128xf32>, vector<128x128xf32>, vector<8x128xf32> -> vector<8x128xf32>
    %c0_15 = arith.constant 0 : index
    %c0_16 = arith.constant 0 : index
    %17 = vector.load %arg7[%c0_15, %c0_16] : memref<1x128xf32, #tpu.memory_space<vmem>>, vector<1x128xf32>
    %18 = vector.broadcast %17 : vector<1x128xf32> to vector<8x128xf32>
    %19 = arith.addf %16, %18 : vector<8x128xf32>
    %20 = math.tanh %19 : vector<8x128xf32>
    %c0_17 = arith.constant 0 : index
    %c0_18 = arith.constant 0 : index
    %21 = vector.load %arg8[%c0_17, %c0_18] : memref<8x128xf32, #tpu.memory_space<vmem>>, vector<8x128xf32>
    tpu.vector_store %arg8[%c0_17, %c0_18], %20 {strides = array<i32>} : memref<8x128xf32, #tpu.memory_space<vmem>>, vector<8x128xf32>,
    return
  }
  func.func @transform_0(%arg0: i32) -> (i32, i32) {
    %c0_i32 = arith.constant 0 : i32
    %c0_i32_0 = arith.constant 0 : i32
    return %arg0, %c0_i32 : i32, i32
  }
  func.func @transform_1(%arg0: i32) -> (i32, i32) {
    %c0_i32 = arith.constant 0 : i32
    %c0_i32_0 = arith.constant 0 : i32
    %c0_i32_1 = arith.constant 0 : i32
    return %c0_i32, %c0_i32_0 : i32, i32
  }
  func.func @transform_2(%arg0: i32) -> (i32, i32) {
    %c0_i32 = arith.constant 0 : i32
    %c0_i32_0 = arith.constant 0 : i32
    %c0_i32_1 = arith.constant 0 : i32
    return %c0_i32, %c0_i32_0 : i32, i32
  }
  func.func @transform_3(%arg0: i32) -> (i32, i32) {
    %c0_i32 = arith.constant 0 : i32
    %c0_i32_0 = arith.constant 0 : i32
    %c0_i32_1 = arith.constant 0 : i32
    return %c0_i32, %c0_i32_0 : i32, i32
  }
  func.func @transform_4(%arg0: i32) -> (i32, i32) {
    %c0_i32 = arith.constant 0 : i32
    %c0_i32_0 = arith.constant 0 : i32
    %c0_i32_1 = arith.constant 0 : i32
    return %c0_i32, %c0_i32_0 : i32, i32
  }
  func.func @transform_5(%arg0: i32) -> (i32, i32) {
    %c0_i32 = arith.constant 0 : i32
    %c0_i32_0 = arith.constant 0 : i32
    %c0_i32_1 = arith.constant 0 : i32
    return %c0_i32, %c0_i32_0 : i32, i32
  }
  func.func @transform_6(%arg0: i32) -> (i32, i32) {
    %c0_i32 = arith.constant 0 : i32
    %c0_i32_0 = arith.constant 0 : i32
    %c0_i32_1 = arith.constant 0 : i32
    return %c0_i32, %c0_i32_0 : i32, i32
  }
  func.func @transform_7(%arg0: i32) -> (i32, i32) {
    %c0_i32 = arith.constant 0 : i32
    %c0_i32_0 = arith.constant 0 : i32
    return %arg0, %c0_i32 : i32, i32
  }
}

</mosaic_0001>

<bundles_post_ra>
// kernel: mlp_deterministic_policy.1
= control target key start
LH: loop header
LB: loop body
LE: loop exit
PB: predicated region body
PF: predicated region fallthrough
CT: control target
= control target key end

     0   :  { %12 = vsyncpa [#allocation3], 0  ;;  %s473_s0 = inlined_call_operand.hbm [shape: f32[8,16], index: 0, kind: input, shape index: {}]   ;;  %s474_s1 = inlined_call_operand.hbm [shape: f32[16,128], index: 1, kind: input, shape index: {}]   ;;  %s475_s2 = inlined_call_operand.hbm [shape: f32[1,128], index: 2, kind: input, shape index: {}]   ;;  %s476_s3 = inlined_call_operand.hbm [shape: f32[128,128], index: 3, kind: input, shape index: {}]   ;;  %s477_s4 = inlined_call_operand.vmem [shape: f32[1,128], index: 4, kind: input, shape index: {}]   ;;  %s478_s5 = inlined_call_operand.hbm [shape: f32[128,128], index: 5, kind: input, shape index: {}]   ;;  %s479_s6 = inlined_call_operand.vmem [shape: f32[1,128], index: 6, kind: input, shape index: {}]   ;;  %s480_s7 = inlined_call_operand.hbm [shape: f32[8,128], index: 7, kind: output, shape index: {}]  }
   0x1   :  { %13 = vsyncpa [#allocation6], 0 }
   0x2   :  { %14 = vsyncpa [#allocation9], 0  ;;  %s31_s26 = sshll.u32 %s474_s1, 4  ;;  %s32_s26 = int_to_ptr.hbm [resolvable:$true] %s31_s26 }
   0x3   :  { %15 = vsyncpa [#allocation4], 0  ;;  %s401_s27 = smov [#allocation5]   ;;  %s55_s8 = sshll.u32 %s476_s3, 4  ;;  %s56_s8 = int_to_ptr.hbm [resolvable:$true] %s55_s8 }
   0x4   :  { %s33_s28 = sshll.u32 %s401_s27, 4  ;;  %s402_s9 = smov 128   ;;  %s34_s28 = int_to_ptr.vmem [resolvable:$true] %s33_s28 }
   0x5   :  { %s403_s10 = smov 8   ;;  %s404_s11 = smov [#allocation8]  }
   0x6   :  { %39 = dma.hbm_to_vmem [thread:$0]  %s32_s26, 256, %s34_s28, [#allocation6], %s402_s9, %s402_s9, %s403_s10  }
   0x7   :  { %s57_s12 = sshll.u32 %s404_s11, 4  ;;  %s21_s15 = sshll.u32 %s473_s0, 4  ;;  %s58_s12 = int_to_ptr.vmem [resolvable:$true] %s57_s12  ;;  %s22_s15 = int_to_ptr.hbm [resolvable:$true] %s21_s15 }
   0x8   :  { %63 = dma.hbm_to_vmem [thread:$0]  %s56_s8, 2048, %s58_s12, [#allocation9], %s402_s9, %s402_s9, %s403_s10  }
   0x9   :  { %s45_s17 = sshll.u32 %s475_s2, 4  ;;  %s405_s18 = smov [#allocation2]   ;;  %s46_s17 = int_to_ptr.hbm [resolvable:$true] %s45_s17 }
   0xa   :  { %s23_s19 = sshll.u32 %s405_s18, 4  ;;  %s406_s3 = smov [#allocation7]   ;;  %s24_s19 = int_to_ptr.vmem [resolvable:$true] %s23_s19 }
   0xb   :  { %26 = dma.hbm_to_vmem [thread:$0]  %s22_s15, 128, %s24_s19, [#allocation3]  }
   0xc   :  { %s47_s20 = sshll.u32 %s406_s3, 4  ;;  %s70_s23 = sshll.u32 %s478_s5, 4  ;;  %s48_s20 = int_to_ptr.vmem [resolvable:$true] %s47_s20  ;;  %s71_s23 = int_to_ptr.hbm [resolvable:$true] %s70_s23 }
   0xd   :  { %50 = dma.hbm_to_vmem [thread:$0]  %s46_s17, 16, %s48_s20, [#allocation6]  }
   0xe   :  { %s407_s0 = smov [#allocation10]  }
   0xf   :  { %s72_s24 = sshll.u32 %s407_s0, 4  ;;  %s73_s24 = int_to_ptr.vmem [resolvable:$true] %s72_s24 }
  0x10   :  { %78 = dma.hbm_to_vmem [thread:$0]  %s71_s23, 2048, %s73_s24, [#allocation9], %s402_s9, %s402_s9, %s403_s10  }
  0x11   :  { %393 = dma.done.wait [#allocation3], 128  }
  0x12   :  { %394 = vsyncadd [#allocation3], 4294967168 }
  0x13   :  { %395 = dma.done.wait [#allocation6], 272  }
  0x14   :  { %396 = vsyncadd [#allocation6], 4294967024 }
  0x15   :  { %397 = dma.done.wait [#allocation9], 4096  }
  0x16   :  { %398 = vsyncadd [#allocation9], 4294963200  ;;  %v103_v0 = vld [vmem:[#allocation5 + $0x8] sm:$0xff]  ;;  %v102_v1 = vld [vmem:[#allocation5] sm:$0xff]  ;;  %vm108_vm0 = vcmask 130048   ;;  %s408_s27 = smov [#allocation11]  }
  0x17   :  { %126 = vmatpush.msra.mxu0 %v103_v0  ;;  %v101_v2 = vld [vmem:[#allocation2] sm:$0xff]  ;;  %v148_v3 = vld [vmem:[#allocation8 + $0x78] sm:$0xff]  ;;  %v147_v4 = vld [vmem:[#allocation8 + $0x70] sm:$0xff]  ;;  %s221_s28 = sshll.u32 %s408_s27, 4  ;;  %s223_s8 = sshll.u32 %s480_s7, 4  ;;  %s222_s28 = int_to_ptr.vmem [resolvable:$true] %s221_s28  ;;  %s224_s8 = int_to_ptr.hbm [resolvable:$true] %s223_s8 }
  0x18   :  { %153 = vmatpush.msra.mxu1 %v148_v3  ;;  %v146_v5 = vld [vmem:[#allocation8 + $0x68] sm:$0xff]  ;;  %v145_v6 = vld [vmem:[#allocation8 + $0x60] sm:$0xff]  ;;  %v144_v7 = vld [vmem:[#allocation8 + $0x58] sm:$0xff] }
  0x19   :  { %127 = vmatpush.msra.mxu0 %v102_v1  ;;  %v143_v8 = vld [vmem:[#allocation8 + $0x50] sm:$0xff]  ;;  %v142_v9 = vld [vmem:[#allocation8 + $0x48] sm:$0xff]  ;;  %v141_v10 = vld [vmem:[#allocation8 + $0x40] sm:$0xff] }
  0x1a   :  { %235 = vmatmul.msk.f32.vlgmr.msra.gmra.mxu0 %vm108_vm0, %v101_v2  ;;  %154 = vmatpush.msra.mxu1 %v147_v4  ;;  %v140_v11 = vld [vmem:[#allocation8 + $0x38] sm:$0xff]  ;;  %v139_v12 = vld [vmem:[#allocation8 + $0x30] sm:$0xff]  ;;  %v138_v13 = vld [vmem:[#allocation8 + $0x28] sm:$0xff] }
  0x1b   :  { %v137_v14 = vld [vmem:[#allocation8 + $0x20] sm:$0xff]  ;;  %v136_v15 = vld [vmem:[#allocation8 + $0x18] sm:$0xff]  ;;  %v135_v16 = vld [vmem:[#allocation8 + $0x10] sm:$0xff] }
  0x1c   :  { %155 = vmatpush.msra.mxu1 %v146_v5  ;;  %v134_v17 = vld [vmem:[#allocation8 + $0x8] sm:$0xff]  ;;  %v133_v18 = vld [vmem:[#allocation8] sm:$0xff]  ;;  %v189_v19 = vld [vmem:[#allocation10 + $0x78] sm:$0xff] }
  0x1d   :  { %v188_v20 = vld [vmem:[#allocation10 + $0x70] sm:$0xff]  ;;  %194 = vmatpush.msra.mxu2 %v189_v19  ;;  %v187_v21 = vld [vmem:[#allocation10 + $0x68] sm:$0xff]  ;;  %v186_v22 = vld [vmem:[#allocation10 + $0x60] sm:$0xff] }
  0x1e   :  { %156 = vmatpush.msra.mxu1 %v145_v6  ;;  %v185_v23 = vld [vmem:[#allocation10 + $0x58] sm:$0xff]  ;;  %v184_v24 = vld [vmem:[#allocation10 + $0x50] sm:$0xff]  ;;  %v183_v25 = vld [vmem:[#allocation10 + $0x48] sm:$0xff] }
  0x1f   :  { %195 = vmatpush.msra.mxu2 %v188_v20  ;;  %v182_v26 = vld [vmem:[#allocation10 + $0x40] sm:$0xff]  ;;  %v181_v27 = vld [vmem:[#allocation10 + $0x38] sm:$0xff]  ;;  %v180_v28 = vld [vmem:[#allocation10 + $0x30] sm:$0xff] }
  0x20   :  { %157 = vmatpush.msra.mxu1 %v144_v7  ;;  %v179_v29 = vld [vmem:[#allocation10 + $0x28] sm:$0xff]  ;;  %v178_v30 = vld [vmem:[#allocation10 + $0x20] sm:$0xff]  ;;  %v177_v31 = vld [vmem:[#allocation10 + $0x18] sm:$0xff] }
  0x21   :  { %196 = vmatpush.msra.mxu2 %v187_v21  ;;  %v244_v32 = vld [vmem:[#allocation7] ss:$0 sm:$0xff]  ;;  %v176_v36 = vld [vmem:[#allocation10 + $0x10] sm:$0xff]  ;;  %v175_v37 = vld [vmem:[#allocation10 + $0x8] sm:$0xff] }
  0x22   :  { %158 = vmatpush.msra.mxu1 %v143_v8  ;;  %v174_v38 = vld [vmem:[#allocation10] sm:$0xff] }
  0x23   :  { %197 = vmatpush.msra.mxu2 %v186_v22  ;;  %v245_v39 = vld [vmem:[%s477_s4] ss:$0 sm:$0xff] }
  0x24   :  { %159 = vmatpush.msra.mxu1 %v142_v9  ;;  %v246_v43 = vld [vmem:[%s479_s6] ss:$0 sm:$0xff] }
  0x25   :  { %198 = vmatpush.msra.mxu2 %v185_v23 }
  0x26   :  { %160 = vmatpush.msra.mxu1 %v141_v10 }
  0x27   :  { %199 = vmatpush.msra.mxu2 %v184_v24 }
  0x28   :  { %161 = vmatpush.msra.mxu1 %v140_v11 }
  0x29   :  { %200 = vmatpush.msra.mxu2 %v183_v25 }
  0x2a   :  { %162 = vmatpush.msra.mxu1 %v139_v12 }
  0x2b   :  { %201 = vmatpush.msra.mxu2 %v182_v26 }
  0x2c   :  { %163 = vmatpush.msra.mxu1 %v138_v13 }
  0x2d   :  { %202 = vmatpush.msra.mxu2 %v181_v27 }
  0x2e   :  { %164 = vmatpush.msra.mxu1 %v137_v14 }
  0x2f   :  { %203 = vmatpush.msra.mxu2 %v180_v28 }
  0x30   :  { %165 = vmatpush.msra.mxu1 %v136_v15 }
  0x31   :  { %204 = vmatpush.msra.mxu2 %v179_v29 }
  0x32   :  { %166 = vmatpush.msra.mxu1 %v135_v16 }
  0x33   :  { %205 = vmatpush.msra.mxu2 %v178_v30 }
  0x34   :  { %167 = vmatpush.msra.mxu1 %v134_v17 }
  0x35   :  { %206 = vmatpush.msra.mxu2 %v177_v31 }
  0x36   :  { %168 = vmatpush.msra.mxu1 %v133_v18 }
  0x37   :  { %207 = vmatpush.msra.mxu2 %v176_v36 }
  0x39   :  { %208 = vmatpush.msra.mxu2 %v175_v37 }
  0x3b   :  { %209 = vmatpush.msra.mxu2 %v174_v38 }
  0x97   :  { %v129_v33 = vpop.f32.mrf.mxu0 }
  0x98   :  { %v130_v34 = vadd.f32 %v244_v32, %v129_v33 }
  0x9a   :  { %v132_v35 = vmax.f32 %v130_v34, 0.0 }
  0x9c   :  { %169 = vmatmul.f32.vlgmr.msra.gmra.mxu1 %v132_v35 }
 0x119   :  { %v170_v40 = vpop.f32.mrf.mxu1 }
 0x11a   :  { %v171_v41 = vadd.f32 %v245_v39, %v170_v40 }
 0x11c   :  { %v173_v42 = vmax.f32 %v171_v41, 0.0 }
 0x11e   :  { %210 = vmatmul.f32.vlgmr.msra.gmra.mxu2 %v173_v42 }
 0x1a1   :  { %v211_v44 = vpop.f32.mrf.mxu2 }
 0x1a2   :  { %v212_v45 = vadd.f32 %v246_v43, %v211_v44 }
 0x1a4   :  { %247 = vtanh.f32 %v212_v45 }
 0x1aa   :  { %v248_v46 = vpop.eup %247 }
 0x1ab   :  { %215 = vst [vmem:[#allocation11] sm:$0xff] %v248_v46 }
 0x1ac   :  { %226 = dma.vmem_to_hbm [thread:$0]  %s222_s28, 128, %s224_s8, [#allocation4]  }
 0x1ad   :  { %399 = dma.done.wait [#allocation4], 128  }
 0x1ae   :  { %400 = vsyncadd [#allocation4], 4294967168 }
 0x1af   :  { %231 = vsyncpa [#allocation3], 1 }
 0x1b0   :  { %232 = vsyncpa [#allocation6], 1 }
 0x1b1   :  { %233 = vsyncpa [#allocation9], 1 }
 0x1b2   :  { %234 = vsyncpa [#allocation4], 1 }

</bundles_post_ra>
